<compile_context>
chip_gen: v5e
topology: v5e:2x2
jax: 0.10.0
libtpu: 0.0.40
codegen_flags: <defaults>
</compile_context>

<pallas_src>
import functools

import jax
import jax.numpy as jnp
import numpy as np
from jax.experimental import pallas as pl
from jax.experimental.pallas import tpu as pltpu


def _layer_norm(z, gamma, beta, eps=1e-5):
    # PyTorch nn.LayerNorm default eps = 1e-5, affine gamma/beta.  f32 math.
    mu = jnp.mean(z, axis=-1, keepdims=True)
    var = jnp.mean((z - mu) ** 2, axis=-1, keepdims=True)
    return (z - mu) * jax.lax.rsqrt(var + eps) * gamma + beta


def _router_kernel(x_ref, s_ref, g_in_ref, b_in_ref, g_sl_ref, b_sl_ref,
                   wq_ref, wkvo_ref, o_ref, *, n_heads, head_dim):
    """One grid step == Bt batch elements.

    x_ref    : (Bt, M, D)       inputs             (bf16 stream)
    s_ref    : (Bt, K, D)       slots              (bf16 stream)
    g/b_*    : (1, D)           LayerNorm affine   (f32, single-buffered)
    wq_ref   : (D, F)           Wq^T * hd**-0.5    (bf16, single-buffered)
    wkvo_ref : (D, H*Dp + F)    [Wv^T∘Wout | Wk^T] (bf16, single-buffered)
    o_ref    : (Bt, K, Dp)      routed output      (bf16, lane-dense padded)
    """
    Bt, M, D = x_ref.shape
    K = s_ref.shape[1]
    Dp = o_ref.shape[-1]
    H, hd = n_heads, head_dim
    F = H * hd

    # LayerNorms in f32 (v5e has no bf16 VPU/EUP).
    x = x_ref[...].astype(jnp.float32)
    s = s_ref[...].astype(jnp.float32)
    xn = _layer_norm(x, g_in_ref[0], b_in_ref[0])        # norm_inputs
    sn = _layer_norm(s, g_sl_ref[0], b_sl_ref[0])        # norm_slots

    xn2 = xn.reshape(Bt * M, D).astype(jnp.bfloat16)
    sn2 = sn.reshape(Bt * K, D).astype(jnp.bfloat16)

    # Q projection (SDPA scale pre-folded into Wq on the host).
    q = jnp.dot(sn2, wq_ref[...], preferred_element_type=jnp.float32)
    q = q.reshape(Bt, K, F).astype(jnp.bfloat16)

    # Fused K + (V ∘ out_proj) projection: one fat matmul over xn.
    # vproj occupies the first H*Dp lanes (128-aligned split), k the last F.
    kvo = jnp.dot(xn2, wkvo_ref[...], preferred_element_type=jnp.float32)
    kvo = kvo.reshape(Bt, M, H * Dp + F)
    vproj = kvo[:, :, :H * Dp].astype(jnp.bfloat16)      # [Bt, M, H*Dp]
    k = kvo[:, :, H * Dp:].astype(jnp.bfloat16)          # [Bt, M, F]

    # Per-head attention.  out_proj is already folded into vproj, so each head
    # accumulates a Dp-wide (lane-dense) contribution: no 16-lane concatenate
    # and no separate out_proj matmul.
    out = jnp.zeros((Bt, K, Dp), jnp.float32)
    # TODO(synk): for large H switch to lax.fori_loop + a VMEM scratch
    # accumulator; for large M add an inner flash-style online-softmax M tile.
    for h in range(H):
        qh = q[:, :, h * hd:(h + 1) * hd]                # [Bt, K, hd]
        kh = k[:, :, h * hd:(h + 1) * hd]                # [Bt, M, hd]
        vh = vproj[:, :, h * Dp:(h + 1) * Dp]            # [Bt, M, Dp]

        logits = jnp.einsum('bkd,bmd->bkm', qh, kh,
                            preferred_element_type=jnp.float32)      # [Bt, K, M]
        logits = logits - jnp.max(logits, axis=-1, keepdims=True)
        p = jnp.exp(logits)
        p = p / jnp.sum(p, axis=-1, keepdims=True)       # exact f32 normalizer

        out = out + jnp.einsum('bkm,bmv->bkv', p.astype(jnp.bfloat16), vh,
                               preferred_element_type=jnp.float32)   # [Bt, K, Dp]

    o_ref[...] = out.astype(o_ref.dtype)


def _tpu_config():
    """(vmem_capacity_bytes, mxu_row_target, has_two_tensorcores) for this chip."""
    vmem_cap = 128 * 1024 * 1024
    try:
        vmem_cap = int(pltpu.get_tpu_info().vmem_capacity_bytes)
    except Exception:
        pass
    kind = ""
    try:
        kind = jax.devices()[0].device_kind.lower()
    except Exception:
        pass
    # Pre-v6 MXUs are 128x128; v6e/v7x passes are 256 wide.
    mxu_rows = 128 if ("v5" in kind or "v4" in kind) else 256
    # v7x-class parts: 64 MiB VMEM per TensorCore, 2 TCs per chip.
    two_tc = vmem_cap <= 64 * 1024 * 1024
    return vmem_cap, mxu_rows, two_tc


def _pick_bt(B, M, K, D, F, Dp, H, *, vmem_budget, row_target, max_bt):
    """Batch tile that targets MXU row fill and fits the VMEM budget."""
    def vmem_need(bt):
        # Pipelined bf16 streams (double-buffered by the BlockSpec pipeline).
        io = 2 * 2 * (bt * M * D + bt * K * D + bt * K * Dp)
        # Single-buffered parameter blocks (bf16 weights + f32 LN vectors).
        wgt = 2 * (D * F + D * (H * Dp + F)) + 4 * 4 * D
        # In-kernel intermediates of the unrolled trace: f32 + bf16 copies of
        # xn/sn/q/k/vproj, per-head f32 logits/p, and the f32 output accumulator.
        mid = (bt * (M + K) * D * 6
               + bt * K * F * 6
               + bt * M * (H * Dp + F) * 6
               + H * bt * K * M * 8
               + bt * K * Dp * 4)
        return io + wgt + mid

    bt = max(1, pl.cdiv(row_target, max(M, 1)))   # fill the MXU row dimension
    bt = min(bt, B, max_bt)                       # never pad the batch past B
    while bt > 1 and vmem_need(bt) > vmem_budget:
        bt -= 1
    return max(bt, 1)


def softmax_attention_router(inputs, slots, params, *, n_heads, head_dim):
    """Pallas SoftmaxAttentionRouter.forward (aug_inputs=None, mask=None).

    Returns (v_out [B, K, D] bf16, aug_vals) where aug_vals is the zero-width
    split the reference code produces when aug_dim == 0.
    """
    B, M, D = inputs.shape
    K = slots.shape[1]
    H, hd = n_heads, head_dim
    F = H * hd
    Dp = D if D % 128 == 0 else ((D + 127) // 128) * 128   # lane-dense output width

    # ---- host-side weight preparation (folds in f32, bf16 for the MXU) ----
    scale = hd ** (-0.5)
    wq_t = (params["wq"].astype(jnp.float32).T * scale).astype(jnp.bfloat16)   # [D, F]
    wk_t = params["wk"].astype(jnp.float32).T                                  # [D, F]
    wv_t = params["wv"].astype(jnp.float32).T                                  # [D, F]

    # out_proj Conv2d weight [D, hd, H, 1] -> [F, D] (rows head-major), pad to Dp.
    wout = jnp.transpose(params["conv_w"][..., 0], (2, 1, 0)).reshape(F, D)
    wout = wout.astype(jnp.float32)
    if Dp != D:
        wout = jnp.zeros((F, Dp), jnp.float32).at[:, :D].set(wout)
    # Fold out_proj into the V projection per head: Wvo_h = Wv_h @ Wout_h  [D, Dp].
    wvo = jnp.einsum('dhc,hcv->dhv',
                     wv_t.reshape(D, H, hd),
                     wout.reshape(H, hd, Dp)).reshape(D, H * Dp)
    # Fuse the K projection with it (both consume the normed inputs).
    wkvo = jnp.concatenate([wvo, wk_t], axis=1).astype(jnp.bfloat16)   # [D, H*Dp+F]

    g_in = params["ln_in_w"].reshape(1, D).astype(jnp.float32)
    b_in = params["ln_in_b"].reshape(1, D).astype(jnp.float32)
    g_sl = params["ln_sl_w"].reshape(1, D).astype(jnp.float32)
    b_sl = params["ln_sl_b"].reshape(1, D).astype(jnp.float32)

    # ---- generation-aware tiling ----
    vmem_cap, mxu_rows, two_tc = _tpu_config()
    vmem_limit = int(0.75 * vmem_cap)            # ~48 MiB on v7x, ~96 MiB on v5e/v6e
    vmem_budget = vmem_cap // 3                  # tile-selection headroom
    max_bt = pl.cdiv(B, 2) if two_tc else B      # >= 2 grid steps on 2-TC chips (v7x)
    Bt = _pick_bt(B, M, K, D, F, Dp, H,
                  vmem_budget=vmem_budget, row_target=mxu_rows, max_bt=max_bt)
    steps = pl.cdiv(B, Bt)
    Bp = steps * Bt

    # bf16 HBM streams; pad batch so no divisor-of-B constraint is needed.
    x_in = inputs.astype(jnp.bfloat16)
    s_in = slots.astype(jnp.bfloat16)
    if Bp != B:
        x_in = jnp.pad(x_in, ((0, Bp - B), (0, 0), (0, 0)))
        s_in = jnp.pad(s_in, ((0, Bp - B), (0, 0), (0, 0)))

    kernel = functools.partial(_router_kernel, n_heads=H, head_dim=hd)
    const = dict(pipeline_mode=pl.Buffered(1))   # single-buffer constant-index blocks

    v_pad = pl.pallas_call(
        kernel,
        out_shape=jax.ShapeDtypeStruct((Bp, K, Dp), jnp.bfloat16),
        grid_spec=pltpu.PrefetchScalarGridSpec(
            num_scalar_prefetch=0,
            grid=(steps,),
            in_specs=[
                pl.BlockSpec((Bt, M, D), lambda b: (b, 0, 0)),            # inputs
                pl.BlockSpec((Bt, K, D), lambda b: (b, 0, 0)),            # slots
                pl.BlockSpec((1, D), lambda b: (0, 0), **const),          # ln_in weight
                pl.BlockSpec((1, D), lambda b: (0, 0), **const),          # ln_in bias
                pl.BlockSpec((1, D), lambda b: (0, 0), **const),          # ln_slots weight
                pl.BlockSpec((1, D), lambda b: (0, 0), **const),          # ln_slots bias
                pl.BlockSpec((D, F), lambda b: (0, 0), **const),          # WqT (pre-scaled)
                pl.BlockSpec((D, H * Dp + F), lambda b: (0, 0), **const), # [Wvo | WkT]
            ],
            out_specs=pl.BlockSpec((Bt, K, Dp), lambda b: (b, 0, 0)),
        ),
        compiler_params=pltpu.CompilerParams(
            dimension_semantics=("parallel",),
            vmem_limit_bytes=vmem_limit,
        ),
    )(x_in, s_in, g_in, b_in, g_sl, b_sl, wq_t, wkvo)

    v_out = v_pad
    if Bp != B:
        v_out = v_out[:B]
    if Dp != D:
        v_out = v_out[:, :, :D]

    # With aug_dim == 0 the reference module splits off a zero-width aug_vals.
    # TODO(synk): aug_inputs (GroupNorm+Conv1d branch), attn mask and dropout>0
    # are not exercised by this config and are not implemented in the kernel.
    aug_vals = jnp.zeros((B, K, 0), dtype=v_out.dtype)
    return v_out, aug_vals


def _reference(inputs, slots, params, *, n_heads, head_dim):
    """Pure-JAX (f32) mirror of the PyTorch forward for correctness checking."""
    H, hd = n_heads, head_dim

    def ln(z, g, b):
        mu = jnp.mean(z, -1, keepdims=True)
        var = jnp.mean((z - mu) ** 2, -1, keepdims=True)
        return (z - mu) / jnp.sqrt(var + 1e-5) * g + b

    xn = ln(inputs, params["ln_in_w"], params["ln_in_b"])
    sn = ln(slots, params["ln_sl_w"], params["ln_sl_b"])

    def proj(x, w):                                      # x [B,N,D] @ w.T -> [B,H,N,hd]
        y = jnp.einsum("bnd,od->bno", x, w)
        return y.reshape(y.shape[0], y.shape[1], H, hd).transpose(0, 2, 1, 3)

    q = proj(sn, params["wq"])                           # [B,H,K,hd]
    k = proj(xn, params["wk"])                           # [B,H,M,hd]
    v = proj(xn, params["wv"])                           # [B,H,M,hd]

    logits = jnp.einsum("bhkd,bhmd->bhkm", q, k) * (hd ** -0.5)
    attn = jax.nn.softmax(logits, axis=-1)
    o = jnp.einsum("bhkm,bhmd->bhkd", attn, v)           # [B,H,K,hd]

    conv_w = params["conv_w"]                            # [D, hd, H, 1]
    return jnp.einsum("bhkc,ochx->bko", o, conv_w)       # kw extent 1


if __name__ == "__main__":
    B, M, K, D = 2, 16, 8, 32
    H, hd = 2, 16                                        # dim % head_dim == 0

    key = jax.random.PRNGKey(0)
    ks = jax.random.split(key, 8)
    inputs = jax.random.normal(ks[0], (B, M, D), jnp.float32)
    slots = jax.random.normal(ks[1], (B, K, D), jnp.float32)

    params = {
        # LayerNorm default init: weight=1, bias=0
        "ln_in_w": jnp.ones((D,), jnp.float32),
        "ln_in_b": jnp.zeros((D,), jnp.float32),
        "ln_sl_w": jnp.ones((D,), jnp.float32),
        "ln_sl_b": jnp.zeros((D,), jnp.float32),
        # Linear weights [out=H*hd, in=D], bias=False
        "wq": jax.random.normal(ks[2], (H * hd, D), jnp.float32) * (D ** -0.5),
        "wk": jax.random.normal(ks[3], (H * hd, D), jnp.float32) * (D ** -0.5),
        "wv": jax.random.normal(ks[4], (H * hd, D), jnp.float32) * (D ** -0.5),
        # out_proj Conv2d weight [out=D, in=hd, kh=H, kw=1], bias=False
        "conv_w": jax.random.normal(ks[5], (D, hd, H, 1), jnp.float32) * 0.1,
    }

    v_out, aug_vals = softmax_attention_router(
        inputs, slots, params, n_heads=H, head_dim=hd)
    v_out = jax.block_until_ready(v_out)

    ref = _reference(inputs, slots, params, n_heads=H, head_dim=hd)
    # bf16 streamed I/O + bf16 MXU operands -> looser tolerance than pure-f32.
    np.testing.assert_allclose(np.asarray(v_out.astype(jnp.float32)),
                               np.asarray(ref), rtol=5e-2, atol=5e-2)

    print("KERNEL_OK")
</pallas_src>

<mosaic_0001>
module attributes {stable_mosaic.version = 11 : i64} {
  func.func @_router_kernel(%arg0: i32, %arg1: memref<2x16x32xbf16, #tpu.memory_space<vmem>>, %arg2: memref<2x8x32xbf16, #tpu.memory_space<vmem>>, %arg3: memref<1x32xf32, #tpu.memory_space<vmem>>, %arg4: memref<1x32xf32, #tpu.memory_space<vmem>>, %arg5: memref<1x32xf32, #tpu.memory_space<vmem>>, %arg6: memref<1x32xf32, #tpu.memory_space<vmem>>, %arg7: memref<32x32xbf16, #tpu.memory_space<vmem>>, %arg8: memref<32x288xbf16, #tpu.memory_space<vmem>>, %arg9: memref<2x8x128xbf16, #tpu.memory_space<vmem>>) attributes {dimension_semantics = [#tpu.dimension_semantics<parallel>], iteration_bounds = array<i64: 1>, scalar_prefetch = 0 : i64, scratch_operands = 0 : i64, tpu.core_type = #tpu.core_type<tc>, window_params = [{transform_indices = @transform_0, window_bounds = array<i64: 2, 16, 32>}, {transform_indices = @transform_1, window_bounds = array<i64: 2, 8, 32>}, {pipeline_mode = #tpu.pipeline_mode<synchronous>, transform_indices = @transform_2, window_bounds = array<i64: 1, 32>}, {pipeline_mode = #tpu.pipeline_mode<synchronous>, transform_indices = @transform_3, window_bounds = array<i64: 1, 32>}, {pipeline_mode = #tpu.pipeline_mode<synchronous>, transform_indices = @transform_4, window_bounds = array<i64: 1, 32>}, {pipeline_mode = #tpu.pipeline_mode<synchronous>, transform_indices = @transform_5, window_bounds = array<i64: 1, 32>}, {pipeline_mode = #tpu.pipeline_mode<synchronous>, transform_indices = @transform_6, window_bounds = array<i64: 32, 32>}, {pipeline_mode = #tpu.pipeline_mode<synchronous>, transform_indices = @transform_7, window_bounds = array<i64: 32, 288>}, {transform_indices = @transform_8, window_bounds = array<i64: 2, 8, 128>}]} {
    %c0 = arith.constant 0 : index
    %c0_0 = arith.constant 0 : index
    %c0_1 = arith.constant 0 : index
    %0 = vector.load %arg1[%c0, %c0_0, %c0_1] : memref<2x16x32xbf16, #tpu.memory_space<vmem>>, vector<2x16x32xbf16>
    %1 = arith.extf %0 : vector<2x16x32xbf16> to vector<2x16x32xf32>
    %c0_2 = arith.constant 0 : index
    %c0_3 = arith.constant 0 : index
    %c0_4 = arith.constant 0 : index
    %2 = vector.load %arg2[%c0_2, %c0_3, %c0_4] : memref<2x8x32xbf16, #tpu.memory_space<vmem>>, vector<2x8x32xbf16>
    %3 = arith.extf %2 : vector<2x8x32xbf16> to vector<2x8x32xf32>
    %c0_5 = arith.constant 0 : index
    %c0_6 = arith.constant 0 : index
    %4 = vector.load %arg3[%c0_5, %c0_6] : memref<1x32xf32, #tpu.memory_space<vmem>>, vector<1x32xf32>
    %5 = vector.shape_cast %4 : vector<1x32xf32> to vector<32xf32>
    %c0_7 = arith.constant 0 : index
    %c0_8 = arith.constant 0 : index
    %6 = vector.load %arg4[%c0_7, %c0_8] : memref<1x32xf32, #tpu.memory_space<vmem>>, vector<1x32xf32>
    %7 = vector.shape_cast %6 : vector<1x32xf32> to vector<32xf32>
    %cst = arith.constant dense<0.000000e+00> : vector<2x16xf32>
    %8 = vector.multi_reduction <add>, %1, %cst [2] : vector<2x16x32xf32> to vector<2x16xf32>
    %9 = vector.shape_cast %8 : vector<2x16xf32> to vector<2x16x1xf32>
    %cst_9 = arith.constant 3.200000e+01 : f32
    %10 = vector.broadcast %cst_9 : f32 to vector<2x16x1xf32>
    %11 = arith.divf %9, %10 : vector<2x16x1xf32>
    %12 = vector.broadcast %11 : vector<2x16x1xf32> to vector<2x16x32xf32>
    %13 = arith.subf %1, %12 : vector<2x16x32xf32>
    %14 = arith.mulf %13, %13 : vector<2x16x32xf32>
    %cst_10 = arith.constant dense<0.000000e+00> : vector<2x16xf32>
    %15 = vector.multi_reduction <add>, %14, %cst_10 [2] : vector<2x16x32xf32> to vector<2x16xf32>
    %16 = vector.shape_cast %15 : vector<2x16xf32> to vector<2x16x1xf32>
    %cst_11 = arith.constant 3.200000e+01 : f32
    %17 = vector.broadcast %cst_11 : f32 to vector<2x16x1xf32>
    %18 = arith.divf %16, %17 : vector<2x16x1xf32>
    %19 = vector.broadcast %11 : vector<2x16x1xf32> to vector<2x16x32xf32>
    %20 = arith.subf %1, %19 : vector<2x16x32xf32>
    %cst_12 = arith.constant 9.99999974E-6 : f32
    %21 = vector.broadcast %cst_12 : f32 to vector<2x16x1xf32>
    %22 = arith.addf %18, %21 : vector<2x16x1xf32>
    %23 = math.rsqrt %22 : vector<2x16x1xf32>
    %24 = vector.broadcast %23 : vector<2x16x1xf32> to vector<2x16x32xf32>
    %25 = arith.mulf %20, %24 : vector<2x16x32xf32>
    %26 = vector.shape_cast %5 : vector<32xf32> to vector<1x1x32xf32>
    %27 = vector.broadcast %26 : vector<1x1x32xf32> to vector<2x16x32xf32>
    %28 = arith.mulf %25, %27 : vector<2x16x32xf32>
    %29 = vector.shape_cast %7 : vector<32xf32> to vector<1x1x32xf32>
    %30 = vector.broadcast %29 : vector<1x1x32xf32> to vector<2x16x32xf32>
    %31 = arith.addf %28, %30 : vector<2x16x32xf32>
    %c0_13 = arith.constant 0 : index
    %c0_14 = arith.constant 0 : index
    %32 = vector.load %arg5[%c0_13, %c0_14] : memref<1x32xf32, #tpu.memory_space<vmem>>, vector<1x32xf32>
    %33 = vector.shape_cast %32 : vector<1x32xf32> to vector<32xf32>
    %c0_15 = arith.constant 0 : index
    %c0_16 = arith.constant 0 : index
    %34 = vector.load %arg6[%c0_15, %c0_16] : memref<1x32xf32, #tpu.memory_space<vmem>>, vector<1x32xf32>
    %35 = vector.shape_cast %34 : vector<1x32xf32> to vector<32xf32>
    %cst_17 = arith.constant dense<0.000000e+00> : vector<2x8xf32>
    %36 = vector.multi_reduction <add>, %3, %cst_17 [2] : vector<2x8x32xf32> to vector<2x8xf32>
    %37 = vector.shape_cast %36 : vector<2x8xf32> to vector<2x8x1xf32>
    %cst_18 = arith.constant 3.200000e+01 : f32
    %38 = vector.broadcast %cst_18 : f32 to vector<2x8x1xf32>
    %39 = arith.divf %37, %38 : vector<2x8x1xf32>
    %40 = vector.broadcast %39 : vector<2x8x1xf32> to vector<2x8x32xf32>
    %41 = arith.subf %3, %40 : vector<2x8x32xf32>
    %42 = arith.mulf %41, %41 : vector<2x8x32xf32>
    %cst_19 = arith.constant dense<0.000000e+00> : vector<2x8xf32>
    %43 = vector.multi_reduction <add>, %42, %cst_19 [2] : vector<2x8x32xf32> to vector<2x8xf32>
    %44 = vector.shape_cast %43 : vector<2x8xf32> to vector<2x8x1xf32>
    %cst_20 = arith.constant 3.200000e+01 : f32
    %45 = vector.broadcast %cst_20 : f32 to vector<2x8x1xf32>
    %46 = arith.divf %44, %45 : vector<2x8x1xf32>
    %47 = vector.broadcast %39 : vector<2x8x1xf32> to vector<2x8x32xf32>
    %48 = arith.subf %3, %47 : vector<2x8x32xf32>
    %cst_21 = arith.constant 9.99999974E-6 : f32
    %49 = vector.broadcast %cst_21 : f32 to vector<2x8x1xf32>
    %50 = arith.addf %46, %49 : vector<2x8x1xf32>
    %51 = math.rsqrt %50 : vector<2x8x1xf32>
    %52 = vector.broadcast %51 : vector<2x8x1xf32> to vector<2x8x32xf32>
    %53 = arith.mulf %48, %52 : vector<2x8x32xf32>
    %54 = vector.shape_cast %33 : vector<32xf32> to vector<1x1x32xf32>
    %55 = vector.broadcast %54 : vector<1x1x32xf32> to vector<2x8x32xf32>
    %56 = arith.mulf %53, %55 : vector<2x8x32xf32>
    %57 = vector.shape_cast %35 : vector<32xf32> to vector<1x1x32xf32>
    %58 = vector.broadcast %57 : vector<1x1x32xf32> to vector<2x8x32xf32>
    %59 = arith.addf %56, %58 : vector<2x8x32xf32>
    %60 = vector.shape_cast %31 : vector<2x16x32xf32> to vector<32x32xf32>
    %61 = arith.truncf %60 : vector<32x32xf32> to vector<32x32xbf16>
    %62 = vector.shape_cast %59 : vector<2x8x32xf32> to vector<16x32xf32>
    %63 = arith.truncf %62 : vector<16x32xf32> to vector<16x32xbf16>
    %c0_22 = arith.constant 0 : index
    %c0_23 = arith.constant 0 : index
    %64 = vector.load %arg7[%c0_22, %c0_23] : memref<32x32xbf16, #tpu.memory_space<vmem>>, vector<32x32xbf16>
    %cst_24 = arith.constant dense<0.000000e+00> : vector<16x32xf32>
    %65 = tpu.matmul %63, %64, %cst_24 {dimension_numbers = #tpu.dot_dimension_numbers<[1], [0], [0], [1], [0, 0, 1, 1], [], []>} : vector<16x32xbf16>, vector<32x32xbf16>, vector<16x32xf32> -> vector<16x32xf32>
    %66 = vector.shape_cast %65 : vector<16x32xf32> to vector<2x8x32xf32>
    %67 = arith.truncf %66 : vector<2x8x32xf32> to vector<2x8x32xbf16>
    %c0_25 = arith.constant 0 : index
    %c0_26 = arith.constant 0 : index
    %68 = vector.load %arg8[%c0_25, %c0_26] : memref<32x288xbf16, #tpu.memory_space<vmem>>, vector<32x288xbf16>
    %cst_27 = arith.constant dense<0.000000e+00> : vector<32x288xf32>
    %69 = tpu.matmul %61, %68, %cst_27 {dimension_numbers = #tpu.dot_dimension_numbers<[1], [0], [0], [1], [0, 0, 1, 1], [], []>} : vector<32x32xbf16>, vector<32x288xbf16>, vector<32x288xf32> -> vector<32x288xf32>
    %70 = vector.shape_cast %69 : vector<32x288xf32> to vector<2x16x288xf32>
    %71 = vector.extract_strided_slice %70 {offsets = [0, 0, 0], sizes = [2, 16, 256], strides = [1, 1, 1]} : vector<2x16x288xf32> to vector<2x16x256xf32>
    %72 = arith.truncf %71 : vector<2x16x256xf32> to vector<2x16x256xbf16>
    %73 = vector.extract_strided_slice %70 {offsets = [0, 0, 256], sizes = [2, 16, 32], strides = [1, 1, 1]} : vector<2x16x288xf32> to vector<2x16x32xf32>
    %74 = arith.truncf %73 : vector<2x16x32xf32> to vector<2x16x32xbf16>
    %cst_28 = arith.constant 0.000000e+00 : f32
    %75 = vector.broadcast %cst_28 : f32 to vector<2x8x128xf32>
    %76 = vector.extract_strided_slice %67 {offsets = [0, 0, 0], sizes = [2, 8, 16], strides = [1, 1, 1]} : vector<2x8x32xbf16> to vector<2x8x16xbf16>
    %77 = vector.extract_strided_slice %74 {offsets = [0, 0, 0], sizes = [2, 16, 16], strides = [1, 1, 1]} : vector<2x16x32xbf16> to vector<2x16x16xbf16>
    %78 = vector.extract_strided_slice %72 {offsets = [0, 0, 0], sizes = [2, 16, 128], strides = [1, 1, 1]} : vector<2x16x256xbf16> to vector<2x16x128xbf16>
    "tpu.trace_start"() <{level = 10 : i32, message = "bkd,bmd->bkm"}> : () -> ()
    %cst_29 = arith.constant dense<0.000000e+00> : vector<2x8x16xf32>
    %79 = tpu.matmul %76, %77, %cst_29 {dimension_numbers = #tpu.dot_dimension_numbers<[2], [2], [1], [1], [0, 0, 0, 1, 1, 1], [0], [0]>} : vector<2x8x16xbf16>, vector<2x16x16xbf16>, vector<2x8x16xf32> -> vector<2x8x16xf32>
    "tpu.trace_stop"() : () -> ()
    %cst_30 = arith.constant dense<0xFF800000> : vector<2x8xf32>
    %80 = vector.multi_reduction <maximumf>, %79, %cst_30 [2] : vector<2x8x16xf32> to vector<2x8xf32>
    %81 = vector.shape_cast %80 : vector<2x8xf32> to vector<2x8x1xf32>
    %82 = vector.broadcast %81 : vector<2x8x1xf32> to vector<2x8x16xf32>
    %83 = arith.subf %79, %82 : vector<2x8x16xf32>
    %84 = math.exp %83 : vector<2x8x16xf32>
    %cst_31 = arith.constant dense<0.000000e+00> : vector<2x8xf32>
    %85 = vector.multi_reduction <add>, %84, %cst_31 [2] : vector<2x8x16xf32> to vector<2x8xf32>
    %86 = vector.shape_cast %85 : vector<2x8xf32> to vector<2x8x1xf32>
    %87 = vector.broadcast %86 : vector<2x8x1xf32> to vector<2x8x16xf32>
    %88 = arith.divf %84, %87 : vector<2x8x16xf32>
    %89 = arith.truncf %88 : vector<2x8x16xf32> to vector<2x8x16xbf16>
    "tpu.trace_start"() <{level = 10 : i32, message = "bkm,bmv->bkv"}> : () -> ()
    %cst_32 = arith.constant dense<0.000000e+00> : vector<2x8x128xf32>
    %90 = tpu.matmul %89, %78, %cst_32 {dimension_numbers = #tpu.dot_dimension_numbers<[2], [1], [1], [2], [0, 0, 0, 1, 1, 2], [0], [0]>} : vector<2x8x16xbf16>, vector<2x16x128xbf16>, vector<2x8x128xf32> -> vector<2x8x128xf32>
    "tpu.trace_stop"() : () -> ()
    %91 = arith.addf %75, %90 : vector<2x8x128xf32>
    %92 = vector.extract_strided_slice %67 {offsets = [0, 0, 16], sizes = [2, 8, 16], strides = [1, 1, 1]} : vector<2x8x32xbf16> to vector<2x8x16xbf16>
    %93 = vector.extract_strided_slice %74 {offsets = [0, 0, 16], sizes = [2, 16, 16], strides = [1, 1, 1]} : vector<2x16x32xbf16> to vector<2x16x16xbf16>
    %94 = vector.extract_strided_slice %72 {offsets = [0, 0, 128], sizes = [2, 16, 128], strides = [1, 1, 1]} : vector<2x16x256xbf16> to vector<2x16x128xbf16>
    "tpu.trace_start"() <{level = 10 : i32, message = "bkd,bmd->bkm"}> : () -> ()
    %cst_33 = arith.constant dense<0.000000e+00> : vector<2x8x16xf32>
    %95 = tpu.matmul %92, %93, %cst_33 {dimension_numbers = #tpu.dot_dimension_numbers<[2], [2], [1], [1], [0, 0, 0, 1, 1, 1], [0], [0]>} : vector<2x8x16xbf16>, vector<2x16x16xbf16>, vector<2x8x16xf32> -> vector<2x8x16xf32>
    "tpu.trace_stop"() : () -> ()
    %cst_34 = arith.constant dense<0xFF800000> : vector<2x8xf32>
    %96 = vector.multi_reduction <maximumf>, %95, %cst_34 [2] : vector<2x8x16xf32> to vector<2x8xf32>
    %97 = vector.shape_cast %96 : vector<2x8xf32> to vector<2x8x1xf32>
    %98 = vector.broadcast %97 : vector<2x8x1xf32> to vector<2x8x16xf32>
    %99 = arith.subf %95, %98 : vector<2x8x16xf32>
    %100 = math.exp %99 : vector<2x8x16xf32>
    %cst_35 = arith.constant dense<0.000000e+00> : vector<2x8xf32>
    %101 = vector.multi_reduction <add>, %100, %cst_35 [2] : vector<2x8x16xf32> to vector<2x8xf32>
    %102 = vector.shape_cast %101 : vector<2x8xf32> to vector<2x8x1xf32>
    %103 = vector.broadcast %102 : vector<2x8x1xf32> to vector<2x8x16xf32>
    %104 = arith.divf %100, %103 : vector<2x8x16xf32>
    %105 = arith.truncf %104 : vector<2x8x16xf32> to vector<2x8x16xbf16>
    "tpu.trace_start"() <{level = 10 : i32, message = "bkm,bmv->bkv"}> : () -> ()
    %cst_36 = arith.constant dense<0.000000e+00> : vector<2x8x128xf32>
    %106 = tpu.matmul %105, %94, %cst_36 {dimension_numbers = #tpu.dot_dimension_numbers<[2], [1], [1], [2], [0, 0, 0, 1, 1, 2], [0], [0]>} : vector<2x8x16xbf16>, vector<2x16x128xbf16>, vector<2x8x128xf32> -> vector<2x8x128xf32>
    "tpu.trace_stop"() : () -> ()
    %107 = arith.addf %91, %106 : vector<2x8x128xf32>
    %108 = arith.truncf %107 : vector<2x8x128xf32> to vector<2x8x128xbf16>
    %c0_37 = arith.constant 0 : index
    %c0_38 = arith.constant 0 : index
    %c0_39 = arith.constant 0 : index
    %109 = vector.load %arg9[%c0_37, %c0_38, %c0_39] : memref<2x8x128xbf16, #tpu.memory_space<vmem>>, vector<2x8x128xbf16>
    tpu.vector_store %arg9[%c0_37, %c0_38, %c0_39], %108 {strides = array<i32>} : memref<2x8x128xbf16, #tpu.memory_space<vmem>>, vector<2x8x128xbf16>,
    return
  }
  func.func @transform_0(%arg0: i32) -> (i32, i32, i32) {
    %c0_i32 = arith.constant 0 : i32
    %c0_i32_0 = arith.constant 0 : i32
    %c0_i32_1 = arith.constant 0 : i32
    return %arg0, %c0_i32, %c0_i32_0 : i32, i32, i32
  }
  func.func @transform_1(%arg0: i32) -> (i32, i32, i32) {
    %c0_i32 = arith.constant 0 : i32
    %c0_i32_0 = arith.constant 0 : i32
    %c0_i32_1 = arith.constant 0 : i32
    return %arg0, %c0_i32, %c0_i32_0 : i32, i32, i32
  }
  func.func @transform_2(%arg0: i32) -> (i32, i32) {
    %c0_i32 = arith.constant 0 : i32
    %c0_i32_0 = arith.constant 0 : i32
    %c0_i32_1 = arith.constant 0 : i32
    return %c0_i32, %c0_i32_0 : i32, i32
  }
  func.func @transform_3(%arg0: i32) -> (i32, i32) {
    %c0_i32 = arith.constant 0 : i32
    %c0_i32_0 = arith.constant 0 : i32
    %c0_i32_1 = arith.constant 0 : i32
    return %c0_i32, %c0_i32_0 : i32, i32
  }
  func.func @transform_4(%arg0: i32) -> (i32, i32) {
    %c0_i32 = arith.constant 0 : i32
    %c0_i32_0 = arith.constant 0 : i32
    %c0_i32_1 = arith.constant 0 : i32
    return %c0_i32, %c0_i32_0 : i32, i32
  }
  func.func @transform_5(%arg0: i32) -> (i32, i32) {
    %c0_i32 = arith.constant 0 : i32
    %c0_i32_0 = arith.constant 0 : i32
    %c0_i32_1 = arith.constant 0 : i32
    return %c0_i32, %c0_i32_0 : i32, i32
  }
  func.func @transform_6(%arg0: i32) -> (i32, i32) {
    %c0_i32 = arith.constant 0 : i32
    %c0_i32_0 = arith.constant 0 : i32
    %c0_i32_1 = arith.constant 0 : i32
    return %c0_i32, %c0_i32_0 : i32, i32
  }
  func.func @transform_7(%arg0: i32) -> (i32, i32) {
    %c0_i32 = arith.constant 0 : i32
    %c0_i32_0 = arith.constant 0 : i32
    %c0_i32_1 = arith.constant 0 : i32
    return %c0_i32, %c0_i32_0 : i32, i32
  }
  func.func @transform_8(%arg0: i32) -> (i32, i32, i32) {
    %c0_i32 = arith.constant 0 : i32
    %c0_i32_0 = arith.constant 0 : i32
    %c0_i32_1 = arith.constant 0 : i32
    return %arg0, %c0_i32, %c0_i32_0 : i32, i32, i32
  }
}

</mosaic_0001>

<bundles_post_ra>
// kernel: tpu_custom_call.1
= control target key start
LH: loop header
LB: loop body
LE: loop exit
PB: predicated region body
PF: predicated region fallthrough
CT: control target
= control target key end

     0   :  { %13 = vsyncpa [#allocation3], 0  ;;  %s1209_s0 = inlined_call_operand.hbm [shape: bf16[2,16,32], index: 0, kind: input, shape index: {}]   ;;  %s1210_s1 = inlined_call_operand.hbm [shape: bf16[2,8,32], index: 1, kind: input, shape index: {}]   ;;  %s1211_s2 = inlined_call_operand.vmem [shape: f32[1,32], index: 2, kind: input, shape index: {}]   ;;  %s1212_s3 = inlined_call_operand.vmem [shape: f32[1,32], index: 3, kind: input, shape index: {}]   ;;  %s1213_s4 = inlined_call_operand.vmem [shape: f32[1,32], index: 4, kind: input, shape index: {}]   ;;  %s1214_s5 = inlined_call_operand.vmem [shape: f32[1,32], index: 5, kind: input, shape index: {}]   ;;  %s1215_s6 = inlined_call_operand.hbm [shape: bf16[32,32], index: 6, kind: input, shape index: {}]   ;;  %s1216_s7 = inlined_call_operand.hbm [shape: bf16[32,288], index: 7, kind: input, shape index: {}]   ;;  %s1217_s8 = inlined_call_operand.hbm [shape: bf16[2,8,128], index: 8, kind: output, shape index: {}]  }
   0x1   :  { %14 = vsyncpa [#allocation6], 0 }
   0x2   :  { %15 = vsyncpa [#allocation9], 0 }
   0x3   :  { %16 = vsyncpa [#allocation4], 0  ;;  %s34_s29 = sshll.u32 %s1210_s1, 4  ;;  %s983_s30 = smov [#allocation5]   ;;  %s35_s29 = int_to_ptr.hbm [resolvable:$true] %s34_s29 }
   0x4   :  { %s36_s9 = sshll.u32 %s983_s30, 4  ;;  %s21_s12 = sshll.u32 %s1209_s0, 4  ;;  %s37_s9 = int_to_ptr.vmem [resolvable:$true] %s36_s9  ;;  %s22_s12 = int_to_ptr.hbm [resolvable:$true] %s21_s12 }
   0x5   :  { %s984_s13 = smov 64   ;;  %s985_s14 = smov 4  }
   0x6   :  { %42 = dma.hbm_to_vmem [thread:$0]  %s35_s29, 128, %s37_s9, [#allocation6], %s984_s13, %s984_s13, %s985_s14  }
   0x7   :  { %s986_s15 = smov [#allocation2]   ;;  %s55_s1 = sshll.u32 %s1215_s6, 4  ;;  %s56_s1 = int_to_ptr.hbm [resolvable:$true] %s55_s1 }
   0x8   :  { %s23_s16 = sshll.u32 %s986_s15, 4  ;;  %s68_s20 = sshll.u32 %s1216_s7, 4  ;;  %s24_s16 = int_to_ptr.vmem [resolvable:$true] %s23_s16  ;;  %s69_s20 = int_to_ptr.hbm [resolvable:$true] %s68_s20 }
   0x9   :  { %29 = dma.hbm_to_vmem [thread:$0]  %s22_s12, 256, %s24_s16, [#allocation3], %s984_s13, %s984_s13, %s985_s14  }
   0xa   :  { %s987_s21 = smov [#allocation7]   ;;  %s988_s23 = smov [#allocation8]  }
   0xb   :  { %s57_s22 = sshll.u32 %s987_s21, 4  ;;  %s70_s6 = sshll.u32 %s988_s23, 4  ;;  %s58_s22 = int_to_ptr.vmem [resolvable:$true] %s57_s22  ;;  %s71_s6 = int_to_ptr.vmem [resolvable:$true] %s70_s6 }
   0xc   :  { %63 = dma.hbm_to_vmem [thread:$0]  %s56_s1, 256, %s58_s22, [#allocation6], %s984_s13, %s984_s13, %s985_s14  }
   0xd   :  { %s989_s24 = smov 192   ;;  %s990_s25 = smov 12  }
   0xe   :  { %76 = dma.hbm_to_vmem [thread:$0]  %s69_s20, 768, %s71_s6, [#allocation9], %s989_s24, %s989_s24, %s990_s25  }
   0xf   :  { %975 = dma.done.wait [#allocation3], 256  }
  0x10   :  { %976 = vsyncadd [#allocation3], 4294967040 }
  0x11   :  { %977 = dma.done.wait [#allocation6], 384  }
  0x12   :  { %978 = vsyncadd [#allocation6], 4294966912 }
  0x13   :  { %979 = dma.done.wait [#allocation9], 768  }
  0x14   :  { %980 = vsyncadd [#allocation9], 4294966528  ;;  %v801_v0 = vld [vmem:[#allocation5] sm:$0xff]   ;;  %vm108_vm0 = vcmask 261120   ;;  %v809_v1 = vld [vmem:[#allocation2 + $0x8] sm:$0xff]   ;;  %v991_v15 = vmov 32.0  }
  0x15   :  { %v793_v2 = vld [vmem:[#allocation2] sm:$0xff]   ;;  %v802_v3 = vunpack.c.l.bf16 %v801_v0  ;;  %v798_v4 = vunpack.c.l.bf16 %v809_v1  ;;  %v803_v9 = vunpack.c.h.bf16 %v801_v0  ;;  %v799_v10 = vunpack.c.h.bf16 %v809_v1  ;;  %v790_v53 = vld [vmem:[#allocation8 + $0x20] sm:$0xf0]  ;;  %v762_v57 = vld [vmem:[#allocation8 + $0x24] sm:$0xf0]  ;;  %s993_s30 = smov [#allocation10]  }
  0x16   :  { %v794_v5 = vunpack.c.l.bf16 %v793_v2  ;;  %v795_v11 = vunpack.c.h.bf16 %v793_v2  ;;  %825 = vrcp.f32 %v991_v15  ;;  %v760_v52 = vld [vmem:[#allocation8 + $0x18] sm:$0xf]  ;;  %v789_v54 = vld [vmem:[#allocation8 + $0x1c] sm:$0xf]  ;;  %v768_v58 = vld [vmem:[#allocation8 + $0x20] sm:$0xf] }
  0x17   :  { %v220_v6 = vsel %vm108_vm0, %v802_v3, 0.0  ;;  %v115_v7 = vsel %vm108_vm0, %v798_v4, 0.0  ;;  %v223_v12 = vsel %vm108_vm0, %v803_v9, 0.0  ;;  %v118_v13 = vsel %vm108_vm0, %v799_v10, 0.0  ;;  %v791_v59 = vld [vmem:[#allocation8 + $0x28] sm:$0xf0] }
  0x18   :  { %v109_v8 = vsel %vm108_vm0, %v794_v5, 0.0  ;;  %221 = vadd.xlane.f32.xlu2 %v220_v6  ;;  %116 = vadd.xlane.f32.xlu1 %v115_v7  ;;  %v112_v14 = vsel %vm108_vm0, %v795_v11, 0.0  ;;  %v761_v56 = vor.u32 %v790_v53, %v760_v52  ;;  %v765_v61 = vor.u32 %v789_v54, %v762_v57  ;;  %v748_v0 = vld [vmem:[#allocation8] sm:$0xf]  ;;  %v787_v1 = vld [vmem:[#allocation8 + $0x8] sm:$0xf0] }
  0x19   :  { %110 = vadd.xlane.f32.xlu0 %v109_v8  ;;  %v769_v62 = vor.u32 %v791_v59, %v768_v58  ;;  %v750_v6 = vld [vmem:[#allocation8 + $0xc] sm:$0xf0]  ;;  %v756_v8 = vld [vmem:[#allocation8 + $0x8] sm:$0xf]  ;;  %v821_v57 = vld [vmem:[%s1211_s2] ss:$0 sm:$0xff] }
  0x1a   :  { %364 = vmatpush.bf16.msra.mxu1 %v761_v56  ;;  %383 = vmatpush.bf16.msra.mxu2 %v765_v61  ;;  %s720_s9 = sshll.u32 %s993_s30, 4  ;;  %s722_s12 = sshll.u32 %s1217_s8, 4  ;;  %s721_s9 = int_to_ptr.vmem [resolvable:$true] %s720_s9  ;;  %s723_s12 = int_to_ptr.hbm [resolvable:$true] %s722_s12 }
  0x1b   :  { %402 = vmatpush.bf16.msra.mxu3 %v769_v62 }
  0x1c   :  { %v826_v16 = vpop.eup %825 }
  0x1d   :  { %v122_v17 = vmul.f32 32.0, %v826_v16  ;;  %vm126_vm1 = vweird.f32 %v826_v16 }
  0x1f   :  { %v123_v18 = vsub.f32 1.0, %v122_v17 }
  0x20   :  { %224 = vadd.xlane.f32.xlu2 %v223_v12  ;;  %119 = vadd.xlane.f32.xlu1 %v118_v13  ;;  %v785_v13 = vld [vmem:[#allocation7 + $0x8] sm:$0xff] }
  0x21   :  { %113 = vadd.xlane.f32.xlu0 %v112_v14  ;;  %v124_v19 = vmul.f32 %v826_v16, %v123_v18  ;;  %302 = vmatpush.bf16.msra.mxu0 %v785_v13 }
  0x23   :  { %v125_v20 = vadd.f32 %v826_v16, %v124_v19  ;;  %v784_v19 = vld [vmem:[#allocation7] sm:$0xff] }
  0x25   :  { %v1066_v21 = vsel %vm126_vm1, %v826_v16, %v125_v20  ;;  %303 = vmatpush.bf16.msra.mxu0 %v784_v19 }
  0x8b   :  { %v222_v22 = vpop.xlane.xlu2 %221  ;;  %v117_v23 = vpop.xlane.xlu1 %116 }
  0x8c   :  { %v130_v24 = vmul.f32 %v1066_v21, %v117_v23  ;;  %v111_v25 = vpop.xlane.xlu0 %110  ;;  %v226_v38 = vmul.f32 %v222_v22, %v1066_v21 }
  0x8d   :  { %v128_v26 = vmul.f32 %v1066_v21, %v111_v25 }
  0x8e   :  { %v1070_v27 = vsub.f32 %v798_v4, %v130_v24  ;;  %v1094_v45 = vsub.f32 %v802_v3, %v226_v38  ;;  %v749_v4 = vor.u32 %v787_v1, %v748_v0 }
  0x8f   :  { %v1072_v28 = vsub.f32 %v794_v5, %v128_v26  ;;  %v786_v5 = vld [vmem:[#allocation8 + $0x4] sm:$0xf] }
  0x90   :  { %v138_v29 = vmul.f32 %v1070_v27, %v1070_v27  ;;  %v230_v50 = vmul.f32 %v1094_v45, %v1094_v45  ;;  %v753_v7 = vor.u32 %v786_v5, %v750_v6  ;;  %365 = vmatpush.bf16.msra.mxu1 %v749_v4  ;;  %v822_v4 = vld [vmem:[%s1212_s3] ss:$0 sm:$0xff] }
  0x91   :  { %v136_v30 = vmul.f32 %v1072_v28, %v1072_v28 }
  0x92   :  { %v146_v31 = vsel %vm108_vm0, %v138_v29, 0.0  ;;  %v232_v51 = vsel %vm108_vm0, %v230_v50, 0.0  ;;  %384 = vmatpush.bf16.msra.mxu2 %v753_v7 }
  0x93   :  { %v225_v32 = vpop.xlane.xlu2 %224  ;;  %147 = vadd.xlane.f32.xlu2 %v146_v31  ;;  %v120_v33 = vpop.xlane.xlu1 %119  ;;  %v140_v34 = vsel %vm108_vm0, %v136_v30, 0.0 }
  0x94   :  { %v227_v35 = vmul.f32 %v225_v32, %v1066_v21  ;;  %v131_v36 = vmul.f32 %v1066_v21, %v120_v33  ;;  %141 = vadd.xlane.f32.xlu0 %v140_v34  ;;  %v114_v37 = vpop.xlane.xlu0 %113 }
  0x95   :  { %v129_v39 = vmul.f32 %v1066_v21, %v114_v37 }
  0x96   :  { %v1084_v40 = vsub.f32 %v803_v9, %v227_v35  ;;  %v1086_v41 = vsub.f32 %v799_v10, %v131_v36  ;;  %v788_v9 = vld [vmem:[#allocation8 + $0x10] sm:$0xf0] }
  0x97   :  { %v1088_v42 = vsub.f32 %v795_v11, %v129_v39  ;;  %v757_v10 = vor.u32 %v788_v9, %v756_v8 }
  0x98   :  { %v231_v43 = vmul.f32 %v1084_v40, %v1084_v40  ;;  %v139_v44 = vmul.f32 %v1086_v41, %v1086_v41 }
  0x99   :  { %v137_v46 = vmul.f32 %v1088_v42, %v1088_v42  ;;  %403 = vmatpush.bf16.msra.mxu3 %v757_v10 }
  0x9a   :  { %v235_v47 = vsel %vm108_vm0, %v231_v43, 0.0  ;;  %v149_v48 = vsel %vm108_vm0, %v139_v44, 0.0 }
  0x9b   :  { %236 = vadd.xlane.f32.xlu2 %v235_v47  ;;  %v143_v49 = vsel %vm108_vm0, %v137_v46, 0.0 }
  0x9c   :  { %150 = vadd.xlane.f32.xlu0 %v149_v48  ;;  %144 = vadd.xlane.f32.xlu1 %v143_v49 }
  0xa4   :  { %233 = vadd.xlane.f32.xlu1 %v232_v51 }
 0x106   :  { %v148_v55 = vpop.xlane.xlu2 %147 }
 0x107   :  { %v142_v60 = vpop.xlane.xlu0 %141  ;;  %v154_v2 = vmul.f32 %v148_v55, %v1066_v21 }
 0x108   :  { %v152_v63 = vmul.f32 %v142_v60, %v1066_v21 }
 0x109   :  { %v1106_v11 = vadd.f32 1e-05, %v154_v2 }
 0x10a   :  { %v156_v3 = vadd.f32 1e-05, %v152_v63 }
 0x10b   :  { %vm186_vm15 = vweird.f32 %v1106_v11 }
 0x10c   :  { %827 = vrsqrt.f32 %v156_v3  ;;  %vm166_vm3 = vweird.f32 %v156_v3 }
 0x10d   :  { %829 = vrsqrt.f32 %v1106_v11 }
 0x10e   :  { %v237_v12 = vpop.xlane.xlu2 %236 }
 0x10f   :  { %v239_v14 = vmul.f32 %v237_v12, %v1066_v21  ;;  %v145_v15 = vpop.xlane.xlu1 %144  ;;  %v151_v16 = vpop.xlane.xlu0 %150 }
 0x110   :  { %v153_v17 = vmul.f32 %v145_v15, %v1066_v21  ;;  %v155_v18 = vmul.f32 %v151_v16, %v1066_v21 }
 0x111   :  { %v241_v20 = vadd.f32 1e-05, %v239_v14 }
 0x112   :  { %v828_v22 = vpop.eup %827  ;;  %v157_v23 = vadd.f32 1e-05, %v153_v17  ;;  %v1112_v24 = vadd.f32 1e-05, %v155_v18 }
 0x113   :  { %v161_v25 = vmul.f32 %v828_v22, %v156_v3  ;;  %831 = vrsqrt.f32 %v241_v20  ;;  %v1115_v31 = vpop.eup %829  ;;  %vm167_vm2 = vweird.f32 %v828_v22  ;;  %vm258_vm6 = vweird.f32 %v241_v20 }
 0x114   :  { %833 = vrsqrt.f32 %v157_v23  ;;  %v181_v39 = vmul.f32 %v1115_v31, %v1106_v11  ;;  %vm168_vm4 = vmor %vm166_vm3, %vm167_vm2  ;;  %vm176_vm8 = vweird.f32 %v157_v23  ;;  %vm196_vm11 = vweird.f32 %v1112_v24  ;;  %v823_v11 = vld [vmem:[%s1213_s4] ss:$0 sm:$0xff] }
 0x115   :  { %v162_v26 = vmul.f32 %v828_v22, %v161_v25  ;;  %835 = vrsqrt.f32 %v1112_v24  ;;  %vm187_vm1 = vweird.f32 %v1115_v31 }
 0x116   :  { %v182_v50 = vmul.f32 %v1115_v31, %v181_v39 }
 0x117   :  { %v163_v29 = vmul.f32 0.5, %v162_v26  ;;  %v234_v30 = vpop.xlane.xlu1 %233 }
 0x118   :  { %v238_v32 = vmul.f32 %v234_v30, %v1066_v21  ;;  %v183_v59 = vmul.f32 0.5, %v182_v50 }
 0x119   :  { %v832_v33 = vpop.eup %831  ;;  %v164_v34 = vsub.f32 1.5, %v163_v29 }
 0x11a   :  { %v834_v35 = vpop.eup %833  ;;  %v253_v36 = vmul.f32 %v832_v33, %v241_v20  ;;  %v240_v37 = vadd.f32 1e-05, %v238_v32  ;;  %vm259_vm7 = vweird.f32 %v832_v33  ;;  %v184_v5 = vsub.f32 1.5, %v183_v59 }
 0x11b   :  { %v1118_v38 = vpop.eup %835  ;;  %v165_v43 = vmul.f32 %v828_v22, %v164_v34  ;;  %v171_v44 = vmul.f32 %v834_v35, %v157_v23  ;;  %vm177_vm5 = vweird.f32 %v834_v35  ;;  %vm1130_vm10 = vmor %vm258_vm6, %vm259_vm7  ;;  %v824_v23 = vld [vmem:[%s1214_s5] ss:$0 sm:$0xff]  ;;  %s992_s5 = smov 112  }
 0x11c   :  { %v254_v46 = vmul.f32 %v832_v33, %v253_v36  ;;  %v191_v47 = vmul.f32 %v1118_v38, %v1112_v24  ;;  %837 = vrsqrt.f32 %v240_v37  ;;  %vm178_vm9 = vmor %vm176_vm8, %vm177_vm5  ;;  %vm197_vm12 = vweird.f32 %v1118_v38 }
 0x11d   :  { %v172_v48 = vmul.f32 %v834_v35, %v171_v44  ;;  %v169_v51 = vsel %vm168_vm4, %v828_v22, %v165_v43  ;;  %vm248_vm13 = vweird.f32 %v240_v37  ;;  %vm1145_vm2 = vmor %vm196_vm11, %vm197_vm12  ;;  %v185_v14 = vmul.f32 %v1115_v31, %v184_v5 }
 0x11e   :  { %v255_v21 = vmul.f32 0.5, %v254_v46  ;;  %v192_v49 = vmul.f32 %v1118_v38, %v191_v47  ;;  %v200_v56 = vmul.f32 %v169_v51, %v1072_v28  ;;  %vm188_vm4 = vmor %vm186_vm15, %vm187_vm1 }
 0x11f   :  { %v173_v52 = vmul.f32 0.5, %v172_v48  ;;  %v189_v20 = vsel %vm188_vm4, %v1115_v31, %v185_v14 }
 0x120   :  { %v256_v53 = vsub.f32 1.5, %v255_v21  ;;  %v193_v55 = vmul.f32 0.5, %v192_v49  ;;  %v207_v3 = vmul.f32 %v821_v57, %v200_v56  ;;  %v202_v26 = vmul.f32 %v189_v20, %v1070_v27 }
 0x121   :  { %v174_v54 = vsub.f32 1.5, %v173_v52 }
 0x122   :  { %v838_v58 = vpop.eup %837  ;;  %v257_v61 = vmul.f32 %v832_v33, %v256_v53  ;;  %v194_v1 = vsub.f32 1.5, %v193_v55  ;;  %v214_v12 = vadd.f32 %v822_v4, %v207_v3  ;;  %v209_v34 = vmul.f32 %v821_v57, %v202_v26 }
 0x123   :  { %v175_v60 = vmul.f32 %v834_v35, %v174_v54  ;;  %v243_v62 = vmul.f32 %v838_v58, %v240_v37  ;;  %vm249_vm14 = vweird.f32 %v838_v58 }
 0x124   :  { %v261_v6 = vsel %vm1130_vm10, %v832_v33, %v257_v61  ;;  %vm250_vm3 = vmor %vm248_vm13, %vm249_vm14  ;;  %v216_v31 = vadd.f32 %v822_v4, %v209_v34 }
 0x125   :  { %v179_v0 = vsel %vm178_vm9, %v834_v35, %v175_v60  ;;  %v244_v2 = vmul.f32 %v838_v58, %v243_v62  ;;  %v263_v15 = vmul.f32 %v261_v6, %v1084_v40 }
 0x126   :  { %v201_v28 = vmul.f32 %v179_v0, %v1088_v42  ;;  %v195_v42 = vmul.f32 %v1118_v38, %v194_v1 }
 0x127   :  { %v245_v7 = vmul.f32 0.5, %v244_v2  ;;  %v268_v22 = vmul.f32 %v823_v11, %v263_v15 }
 0x128   :  { %v208_v8 = vmul.f32 %v821_v57, %v201_v28  ;;  %v199_v18 = vsel %vm1145_vm2, %v1118_v38, %v195_v42 }
 0x129   :  { %v246_v10 = vsub.f32 1.5, %v245_v7  ;;  %v203_v24 = vmul.f32 %v199_v18, %v1086_v41  ;;  %v273_v30 = vadd.f32 %v824_v23, %v268_v22 }
 0x12a   :  { %v215_v13 = vadd.f32 %v822_v4, %v208_v8 }
 0x12b   :  { %v247_v16 = vmul.f32 %v838_v58, %v246_v10  ;;  %v210_v32 = vmul.f32 %v821_v57, %v203_v24 }
 0x12c   :  { %v274_v17 = vpack.c.bf16 %v215_v13, %v214_v12 }
 0x12d   :  { %v251_v19 = vsel %vm250_vm3, %v838_v58, %v247_v16 }
 0x12e   :  { %770 = vmatmul.msk.bf16.vlgmr.msra.gmra.mxu1 %vm108_vm0, %v274_v17  ;;  %772 = vmatmul.msk.bf16.vlgmr.msra.gmra.mxu2 %vm108_vm0, %v274_v17  ;;  %v262_v40 = vmul.f32 %v251_v19, %v1094_v45  ;;  %v217_v45 = vadd.f32 %v822_v4, %v210_v32 }
 0x12f   :  { %774 = vmatmul.msk.bf16.vlgmr.msra.gmra.mxu3 %vm108_vm0, %v274_v17 }
 0x130   :  { %v267_v25 = vmul.f32 %v823_v11, %v262_v40  ;;  %v275_v35 = vpack.c.bf16 %v217_v45, %v216_v31 }
 0x132   :  { %v272_v29 = vadd.f32 %v824_v23, %v267_v25 }
 0x134   :  { %v276_v33 = vpack.c.bf16 %v273_v30, %v272_v29 }
 0x136   :  { %745 = vmatmul.msk.bf16.vlgmr.msra.gmra.mxu0 %vm108_vm0, %v276_v33 }
 0x13e   :  { %771 = vmatmul.msk.bf16.gmra.mxu1 %vm108_vm0, %v275_v35  ;;  %773 = vmatmul.msk.bf16.gmra.mxu2 %vm108_vm0, %v275_v35 }
 0x13f   :  { %775 = vmatmul.msk.bf16.gmra.mxu3 %vm108_vm0, %v275_v35  ;;  %vm428_vm0 = vcmask 130048  }
 0x1ab   :  { %v367_v41 = vpop.f32.mrf.mxu1 }
 0x1b1   :  { %v386_v36 = vpop.f32.mrf.mxu2 }
 0x1b2   :  { %v405_v37 = vpop.f32.mrf.mxu3  ;;  %v415_v43 = vpack.c.bf16 %v386_v36, %v367_v41 }
 0x1b3   :  { %v305_v27 = vpop.f32.mrf.mxu0  ;;  %v369_v39 = vpop.f32.mrf.mxu1  ;;  %v419_v46 = vpack.c.bf16 %v405_v37, %v405_v37 }
 0x1b4   :  { %v310_v38 = vpack.c.bf16 %v305_v27, %v305_v27  ;;  %v626_v21 = vrot.slane %v415_v43, 4  ;;  %v672_v52 = vunpack.c.l.b16 %v415_v43 }
 0x1b5   :  { %v425_v56 = vunpack.c.l.b16 %v419_v46 }
 0x1b6   :  { %v523_v44 = vunpack.c.l.b16 %v310_v38  ;;  %v628_v58 = vunpack.c.l.b16 %v626_v21 }
 0x1b8   :  { %v524_v47 = vpack.c.b16 %v523_v44, %v523_v44 }
 0x1b9   :  { %v388_v48 = vpop.f32.mrf.mxu2 }
 0x1ba   :  { %v416_v49 = vpack.c.bf16 %v388_v48, %v369_v39  ;;  %v407_v50 = vpop.f32.mrf.mxu3  ;;  %525 = vrot.lane.b32.xlu2 %v524_v47, %s992_s5 }
 0x1bb   :  { %v420_v51 = vpack.c.bf16 %v407_v50, %v407_v50  ;;  %v307_v55 = vpop.f32.mrf.mxu0  ;;  %v372_v63 = vpop.f32.mrf.mxu1 }
 0x1bc   :  { %v627_v53 = vrot.slane %v416_v49, 4  ;;  %v673_v54 = vunpack.c.l.b16 %v416_v49  ;;  %v311_v62 = vpack.c.bf16 %v307_v55, %v307_v55 }
 0x1bd   :  { %v426_v57 = vunpack.c.l.b16 %v420_v51 }
 0x1be   :  { %v629_v59 = vunpack.c.l.b16 %v627_v53  ;;  %v674_v60 = vpack.c.b16 %v673_v54, %v672_v52  ;;  %v549_v3 = vunpack.c.l.b16 %v311_v62 }
 0x1bf   :  { %v427_v61 = vpack.c.b16 %v426_v57, %v425_v56 }
 0x1c0   :  { %v630_v0 = vpack.c.b16 %v629_v59, %v628_v58  ;;  %v550_v5 = vpack.c.b16 %v549_v3, %v549_v3 }
 0x1c1   :  { %527 = vrot.lane.b32.xlu0 %v427_v61, %s992_s5  ;;  %v391_v1 = vpop.f32.mrf.mxu2  ;;  %v433_v28 = vsel %vm428_vm0, %v427_v61, 0 }
 0x1c2   :  { %v410_v2 = vpop.f32.mrf.mxu3  ;;  %442 = vmatpush.bf16.xpose.msrb.mxu0 %v433_v28  ;;  %642 = vmatpush.bf16.msrb.mxu3 %v630_v0  ;;  %v417_v4 = vpack.c.bf16 %v391_v1, %v372_v63 }
 0x1c3   :  { %v421_v6 = vpack.c.bf16 %v410_v2, %v410_v2  ;;  %v374_v7 = vpop.f32.mrf.mxu1 }
 0x1c4   :  { %v650_v42 = vrot.slane %v417_v4, 4  ;;  %v692_v13 = vunpack.c.l.b16 %v417_v4 }
 0x1c5   :  { %v450_v11 = vunpack.c.l.b16 %v421_v6 }
 0x1c6   :  { %v652_v17 = vunpack.c.l.b16 %v650_v42 }
 0x1c9   :  { %551 = vrot.lane.b32.xlu0 %v550_v5, %s992_s5  ;;  %776 = vmatmul.msk.bf16.vlgmr.msrb.gmra.mxu0 %vm428_vm0, %v310_v38  ;;  %v393_v8 = vpop.f32.mrf.mxu2 }
 0x1ca   :  { %v418_v9 = vpack.c.bf16 %v393_v8, %v374_v7  ;;  %v412_v10 = vpop.f32.mrf.mxu3 }
 0x1cb   :  { %v422_v12 = vpack.c.bf16 %v412_v10, %v412_v10 }
 0x1cc   :  { %v651_v14 = vrot.slane %v418_v9, 4  ;;  %v693_v15 = vunpack.c.l.b16 %v418_v9 }
 0x1cd   :  { %v451_v16 = vunpack.c.l.b16 %v422_v12 }
 0x1ce   :  { %v653_v18 = vunpack.c.l.b16 %v651_v14  ;;  %v694_v19 = vpack.c.b16 %v693_v15, %v692_v13 }
 0x1cf   :  { %v452_v20 = vpack.c.b16 %v451_v16, %v450_v11 }
 0x1d0   :  { %v654_v40 = vpack.c.b16 %v653_v18, %v652_v17 }
 0x1d1   :  { %553 = vrot.lane.b32.xlu1 %v452_v20, %s992_s5  ;;  %v457_v22 = vsel %vm428_vm0, %v452_v20, 0 }
 0x1d2   :  { %466 = vmatpush.bf16.xpose.msra.mxu0 %v457_v22 }
 0x1d9   :  { %777 = vmatmul.msk.bf16.vlgmr.msra.gmra.mxu0 %vm428_vm0, %v311_v62 }
 0x1da   :  { %666 = vmatpush.bf16.msrb.mxu0 %v654_v40 }
 0x214   :  { %v526_v25 = vpop.permute.xlu2 %525 }
 0x233   :  { %v528_v23 = vpop.permute.xlu0 %527 }
 0x234   :  { %v533_v24 = vsel %vm428_vm0, %v528_v23, 0 }
 0x235   :  { %542 = vmatpush.bf16.xpose.msrb.mxu1 %v533_v24 }
 0x23b   :  { %v552_v33 = vpop.permute.xlu0 %551 }
 0x23c   :  { %778 = vmatmul.msk.bf16.vlgmr.msrb.gmra.mxu1 %vm428_vm0, %v526_v25 }
 0x23d   :  { %686 = vmatpush.bf16.msra.mxu1 %v674_v60 }
 0x243   :  { %v554_v26 = vpop.permute.xlu1 %553 }
 0x244   :  { %v559_v29 = vsel %vm428_vm0, %v554_v26, 0 }
 0x245   :  { %568 = vmatpush.bf16.xpose.msrb.mxu2 %v559_v29 }
 0x246   :  { %v444_v30 = vpop.f32.mrf.mxu0 }
 0x247   :  { %v472_v32 = vsel %vm428_vm0, %v444_v30, -inf }
 0x248   :  { %473 = vmax.xlane.f32.xlu0 %v472_v32 }
 0x24c   :  { %779 = vmatmul.msk.bf16.vlgmr.msrb.gmra.mxu2 %vm428_vm0, %v552_v33 }
 0x24d   :  { %706 = vmatpush.bf16.msra.mxu2 %v694_v19 }
 0x24e   :  { %v446_v34 = vpop.f32.mrf.mxu0 }
 0x256   :  { %v468_v45 = vpop.f32.mrf.mxu0 }
 0x257   :  { %v475_v31 = vsel %vm428_vm0, %v468_v45, -inf }
 0x258   :  { %476 = vmax.xlane.f32.xlu2 %v475_v31 }
 0x25e   :  { %v470_v35 = vpop.f32.mrf.mxu0 }
 0x2b9   :  { %v544_v41 = vpop.f32.mrf.mxu1 }
 0x2ba   :  { %v574_v36 = vsel %vm428_vm0, %v544_v41, -inf }
 0x2bb   :  { %575 = vmax.xlane.f32.xlu1 %v574_v36  ;;  %v474_v27 = vpop.xlane.xlu0 %473 }
 0x2bc   :  { %v478_v38 = vsub.f32 %v444_v30, %v474_v27 }
 0x2be   :  { %v480_v39 = vmul.f32 1.442695, %v478_v38 }
 0x2c0   :  { %839 = vpow2.f32 %v480_v39 }
 0x2c1   :  { %v546_v37 = vpop.f32.mrf.mxu1 }
 0x2c6   :  { %v840_v21 = vpop.eup %839 }
 0x2c7   :  { %v484_v52 = vsel %vm428_vm0, %v840_v21, 0.0 }
 0x2cb   :  { %v477_v43 = vpop.xlane.xlu2 %476 }
 0x2cc   :  { %v479_v44 = vsub.f32 %v468_v45, %v477_v43 }
 0x2ce   :  { %v482_v46 = vmul.f32 1.442695, %v479_v44 }
 0x2cf   :  { %v570_v47 = vpop.f32.mrf.mxu2 }
 0x2d0   :  { %841 = vpow2.f32 %v482_v46  ;;  %v577_v48 = vsel %vm428_vm0, %v570_v47, -inf }
 0x2d1   :  { %578 = vmax.xlane.f32.xlu2 %v577_v48 }
 0x2d6   :  { %v842_v49 = vpop.eup %841 }
 0x2d7   :  { %v572_v50 = vpop.f32.mrf.mxu2  ;;  %v487_v51 = vsel %vm428_vm0, %v842_v49, 0.0 }
 0x2d8   :  { %488 = vadd.xlane.f32.xlu1 %v487_v51 }
 0x2d9   :  { %485 = vadd.xlane.f32.xlu2 %v484_v52 }
 0x32e   :  { %v576_v53 = vpop.xlane.xlu1 %575 }
 0x32f   :  { %v580_v54 = vsub.f32 %v544_v41, %v576_v53 }
 0x331   :  { %v582_v55 = vmul.f32 1.442695, %v580_v54 }
 0x333   :  { %843 = vpow2.f32 %v582_v55 }
 0x339   :  { %v1189_v56 = vpop.eup %843 }
 0x33a   :  { %v586_v57 = vsel %vm428_vm0, %v1189_v56, 0.0 }
 0x33b   :  { %587 = vadd.xlane.f32.xlu0 %v586_v57 }
 0x344   :  { %v579_v58 = vpop.xlane.xlu2 %578 }
 0x345   :  { %v581_v59 = vsub.f32 %v570_v47, %v579_v58 }
 0x347   :  { %v584_v60 = vmul.f32 1.442695, %v581_v59 }
 0x349   :  { %845 = vpow2.f32 %v584_v60 }
 0x34b   :  { %v489_v61 = vpop.xlane.xlu1 %488 }
 0x34c   :  { %847 = vrcp.f32 %v489_v61  ;;  %v486_v62 = vpop.xlane.xlu2 %485  ;;  %v516_v5 = vand.u32 2147483648, %v489_v61  ;;  %v514_v8 = vand.u32 2147483647, %v489_v61  ;;  %vm510_vm7 = vweird.f32 %v489_v61 }
 0x34d   :  { %849 = vrcp.f32 %v486_v62  ;;  %v501_v42 = vand.u32 2147483648, %v486_v62  ;;  %v499_v10 = vand.u32 2147483647, %v486_v62  ;;  %vm495_vm9 = vweird.f32 %v486_v62 }
 0x34e   :  { %v517_v13 = vor.u32 1.1754944e-38, %v516_v5  ;;  %vm515_vm10 = vcmp.eq.f32.partialorder %v514_v8, 8.507059e+37 }
 0x34f   :  { %v1193_v63 = vpop.eup %845  ;;  %v502_v11 = vor.u32 1.1754944e-38, %v501_v42  ;;  %vm500_vm12 = vcmp.eq.f32.partialorder %v499_v10, 8.507059e+37 }
 0x350   :  { %v589_v0 = vsel %vm428_vm0, %v1193_v63, 0.0 }
 0x351   :  { %590 = vadd.xlane.f32.xlu1 %v589_v0 }
 0x352   :  { %v848_v1 = vpop.eup %847 }
 0x353   :  { %v850_v28 = vpop.eup %849  ;;  %v506_v2 = vmul.f32 %v848_v1, %v489_v61  ;;  %vm511_vm5 = vweird.f32 %v848_v1 }
 0x354   :  { %v491_v3 = vmul.f32 %v850_v28, %v486_v62  ;;  %vm496_vm6 = vweird.f32 %v850_v28  ;;  %vm512_vm8 = vmor %vm510_vm7, %vm511_vm5 }
 0x355   :  { %v507_v4 = vsub.f32 1.0, %v506_v2  ;;  %vm497_vm11 = vmor %vm495_vm9, %vm496_vm6 }
 0x356   :  { %v492_v6 = vsub.f32 1.0, %v491_v3 }
 0x357   :  { %v508_v7 = vmul.f32 %v848_v1, %v507_v4 }
 0x358   :  { %v493_v9 = vmul.f32 %v850_v28, %v492_v6 }
 0x359   :  { %v509_v12 = vadd.f32 %v848_v1, %v508_v7 }
 0x35a   :  { %v494_v14 = vadd.f32 %v850_v28, %v493_v9 }
 0x35b   :  { %v513_v15 = vsel %vm512_vm8, %v848_v1, %v509_v12 }
 0x35c   :  { %v518_v16 = vsel %vm515_vm10, %v517_v13, %v513_v15  ;;  %v498_v17 = vsel %vm497_vm11, %v850_v28, %v494_v14 }
 0x35d   :  { %v519_v18 = vmul.f32 %v842_v49, %v518_v16  ;;  %v503_v19 = vsel %vm500_vm12, %v502_v11, %v498_v17 }
 0x35e   :  { %v504_v20 = vmul.f32 %v840_v21, %v503_v19 }
 0x35f   :  { %v521_v40 = vpack.c.bf16 %v519_v18, %v519_v18 }
 0x360   :  { %v520_v22 = vpack.c.bf16 %v504_v20, %v504_v20 }
 0x361   :  { %783 = vmatmul.msk.bf16.vlgmr.msra.gmra.mxu2 %vm428_vm0, %v521_v40 }
 0x362   :  { %782 = vmatmul.msk.bf16.vlgmr.msra.gmra.mxu1 %vm428_vm0, %v520_v22 }
 0x3ae   :  { %v588_v23 = vpop.xlane.xlu0 %587 }
 0x3af   :  { %851 = vrcp.f32 %v588_v23  ;;  %v603_v29 = vand.u32 2147483648, %v588_v23  ;;  %v601_v32 = vand.u32 2147483647, %v588_v23  ;;  %vm597_vm14 = vweird.f32 %v588_v23 }
 0x3b1   :  { %v604_v34 = vor.u32 1.1754944e-38, %v603_v29  ;;  %vm602_vm1 = vcmp.eq.f32.partialorder %v601_v32, 8.507059e+37 }
 0x3b5   :  { %v852_v24 = vpop.eup %851 }
 0x3b6   :  { %v593_v25 = vmul.f32 %v852_v24, %v588_v23  ;;  %vm598_vm13 = vweird.f32 %v852_v24 }
 0x3b7   :  { %vm599_vm15 = vmor %vm597_vm14, %vm598_vm13 }
 0x3b8   :  { %v594_v26 = vsub.f32 1.0, %v593_v25 }
 0x3ba   :  { %v595_v30 = vmul.f32 %v852_v24, %v594_v26 }
 0x3bc   :  { %v596_v33 = vadd.f32 %v852_v24, %v595_v30 }
 0x3be   :  { %v600_v45 = vsel %vm599_vm15, %v852_v24, %v596_v33 }
 0x3bf   :  { %v605_v31 = vsel %vm602_vm1, %v604_v34, %v600_v45 }
 0x3c0   :  { %v606_v35 = vmul.f32 %v1189_v56, %v605_v31 }
 0x3c2   :  { %v622_v41 = vpack.c.bf16 %v606_v35, %v606_v35 }
 0x3c4   :  { %v591_v36 = vpop.xlane.xlu1 %590  ;;  %780 = vmatmul.msk.bf16.vlgmr.msrb.gmra.mxu3 %vm428_vm0, %v622_v41 }
 0x3c5   :  { %853 = vrcp.f32 %v591_v36  ;;  %v618_v39 = vand.u32 2147483648, %v591_v36  ;;  %v616_v44 = vand.u32 2147483647, %v591_v36  ;;  %vm612_vm3 = vweird.f32 %v591_v36 }
 0x3c7   :  { %v619_v47 = vor.u32 1.1754944e-38, %v618_v39  ;;  %vm617_vm5 = vcmp.eq.f32.partialorder %v616_v44, 8.507059e+37 }
 0x3cb   :  { %v854_v37 = vpop.eup %853 }
 0x3cc   :  { %v608_v27 = vmul.f32 %v854_v37, %v591_v36  ;;  %vm613_vm2 = vweird.f32 %v854_v37 }
 0x3cd   :  { %vm614_vm4 = vmor %vm612_vm3, %vm613_vm2 }
 0x3ce   :  { %v609_v38 = vsub.f32 1.0, %v608_v27 }
 0x3d0   :  { %v610_v43 = vmul.f32 %v854_v37, %v609_v38 }
 0x3d2   :  { %v611_v46 = vadd.f32 %v854_v37, %v610_v43 }
 0x3d4   :  { %v615_v48 = vsel %vm614_vm4, %v854_v37, %v611_v46 }
 0x3d5   :  { %v620_v21 = vsel %vm617_vm5, %v619_v47, %v615_v48 }
 0x3d6   :  { %v621_v49 = vmul.f32 %v1193_v63, %v620_v21 }
 0x3d8   :  { %v623_v50 = vpack.c.bf16 %v621_v49, %v621_v49 }
 0x3da   :  { %781 = vmatmul.msk.bf16.vlgmr.msrb.gmra.mxu0 %vm428_vm0, %v623_v50 }
 0x3df   :  { %v688_v51 = vpop.f32.mrf.mxu1 }
 0x3e4   :  { %v708_v52 = vpop.f32.mrf.mxu2 }
 0x3e7   :  { %v690_v53 = vpop.f32.mrf.mxu1 }
 0x3ec   :  { %v710_v54 = vpop.f32.mrf.mxu2 }
 0x447   :  { %v644_v55 = vpop.f32.mrf.mxu3 }
 0x448   :  { %v689_v58 = vadd.f32 %v688_v51, %v644_v55 }
 0x44f   :  { %v646_v56 = vpop.f32.mrf.mxu3 }
 0x457   :  { %v668_v57 = vpop.f32.mrf.mxu0 }
 0x458   :  { %v709_v59 = vadd.f32 %v708_v52, %v668_v57 }
 0x45a   :  { %v807_v60 = vpack.c.bf16 %v709_v59, %v689_v58 }
 0x45c   :  { %808 = vst [vmem:[#allocation10] sm:$0xff] %v807_v60  }
 0x45d   :  { %728 = dma.vmem_to_hbm [thread:$0]  %s721_s9, 128, %s723_s12, [#allocation4], %s984_s13, %s984_s13, %s985_s14  }
 0x45f   :  { %v670_v61 = vpop.f32.mrf.mxu0 }
 0x460   :  { %981 = dma.done.wait [#allocation4], 128  }
 0x461   :  { %982 = vsyncadd [#allocation4], 4294967168 }
 0x462   :  { %733 = vsyncpa [#allocation3], 1 }
 0x463   :  { %734 = vsyncpa [#allocation6], 1 }
 0x464   :  { %735 = vsyncpa [#allocation9], 1 }
 0x465   :  { %736 = vsyncpa [#allocation4], 1 }

</bundles_post_ra>
